<compile_context>
chip_gen: v5e
topology: v5e:2x2
jax: 0.10.0
libtpu: 0.0.40
codegen_flags: <defaults>
</compile_context>

<pallas_src>
import functools
import math

import jax
import jax.numpy as jnp
from jax.experimental import pallas as pl
from jax.experimental.pallas import tpu as pltpu

LN_EPS = 1e-12   # ESPnet LayerNorm eps (torch.nn.LayerNorm default would be 1e-5)
NEG_INF = -1e30


# --------------------------------------------------------------------------
# Kernel A: K/V projection -> head-major bf16 layout, K pre-transposed.
#   K: (B, H, dk, T)   V: (B, H, T, dk)
# One grid step per batch element (full T resident).
# --------------------------------------------------------------------------
def _kv_proj_kernel(x_ref, wk_ref, bk_ref, wv_ref, bv_ref, kt_ref, v_ref, *, n_heads):
    bf16 = jnp.bfloat16
    xb = x_ref[0].astype(bf16)                               # (T, D)
    k = jnp.dot(xb, wk_ref[...], preferred_element_type=jnp.float32) + bk_ref[...]
    v = jnp.dot(xb, wv_ref[...], preferred_element_type=jnp.float32) + bv_ref[...]

    T, D = k.shape
    dk = D // n_heads
    kt = k.T                                                  # (D, T) lane-dense along T
    vb = v.astype(bf16)
    for h in range(n_heads):                                  # static-slice stores only
        kt_ref[0, h] = kt[h * dk:(h + 1) * dk, :].astype(bf16)
        v_ref[0, h] = vb[:, h * dk:(h + 1) * dk]


# --------------------------------------------------------------------------
# Kernel B: Q projection + attention (full keys) + output proj + LN1 + FFN + LN2
# per (batch, query-tile) grid point.
# --------------------------------------------------------------------------
def _attn_ffn_kernel(x_ref, mask_ref, kt_ref, v_ref,
                     wq_ref, bq_ref, wo_ref, bo_ref,
                     w1_ref, b1_ref, w2_ref, b2_ref,
                     g1_ref, be1_ref, g2_ref, be2_ref,
                     out_ref, *, n_heads):
    bf16 = jnp.bfloat16
    f32 = jnp.float32

    x = x_ref[0]                                   # (Tq, D) f32 (residual path)
    xb = x.astype(bf16)
    Tq, D = x.shape
    dk = D // n_heads

    # ---- Q projection in-kernel (1/sqrt(dk) folded into Wq/bq by the wrapper)
    q = jnp.dot(xb, wq_ref[...], preferred_element_type=f32) + bq_ref[...]   # (Tq, D)
    qb = q.astype(bf16)

    # ---- key-mask bias computed once; scalar guard for fully-padded rows
    maskf = mask_ref[0]                            # (1, T) f32
    bias = jnp.where(maskf > 0.0, 0.0, NEG_INF)    # (1, T) f32
    has_valid = (jnp.max(maskf, axis=-1, keepdims=True) > 0.0).astype(f32)  # (1, 1)

    # ---- per-head attention: bounds the softmax working set to O(Tq*T) f32,
    #      every matmul runs bf16 on the MXU with f32 accumulation.
    ctx_parts = []
    for h in range(n_heads):
        qh = qb[:, h * dk:(h + 1) * dk]                               # (Tq, dk) bf16
        s = jnp.dot(qh, kt_ref[0, h], preferred_element_type=f32)     # (Tq, T)
        s = s + bias
        m = jnp.max(s, axis=-1, keepdims=True)
        e = jnp.exp(s - m)                         # masked keys underflow to exactly 0
        r = pl.reciprocal(jnp.sum(e, axis=-1, keepdims=True), approx=True)  # EUP
        p = (e * r).astype(bf16)                   # (Tq, T) bf16, no post-softmax where
        ctx_parts.append(jnp.dot(p, v_ref[0, h], preferred_element_type=f32))  # (Tq, dk)

    # ---- concat heads -> lane-dense (Tq, D); single D-deep output projection
    ctx = jnp.concatenate(ctx_parts, axis=-1) * has_valid             # (Tq, D) f32
    attn_out = jnp.dot(ctx.astype(bf16), wo_ref[...],
                       preferred_element_type=f32) + bo_ref[...]

    # ---- residual + LayerNorm1 (post-norm: normalize_before=False); dropout1=id
    x1 = x + attn_out
    mu1 = jnp.mean(x1, axis=-1, keepdims=True)
    var1 = jnp.mean((x1 - mu1) ** 2, axis=-1, keepdims=True)
    xn1 = (x1 - mu1) * jax.lax.rsqrt(var1 + LN_EPS) * g1_ref[...] + be1_ref[...]

    # ---- position-wise feed forward (Linear -> ReLU -> Linear), bf16 MXU ops
    h1 = jnp.dot(xn1.astype(bf16), w1_ref[...],
                 preferred_element_type=f32) + b1_ref[...]
    h1 = jnp.maximum(h1, 0.0)
    ff = jnp.dot(h1.astype(bf16), w2_ref[...],
                 preferred_element_type=f32) + b2_ref[...]

    # ---- residual + LayerNorm2; dropout2=id
    x2 = xn1 + ff
    mu2 = jnp.mean(x2, axis=-1, keepdims=True)
    var2 = jnp.mean((x2 - mu2) ** 2, axis=-1, keepdims=True)
    out = (x2 - mu2) * jax.lax.rsqrt(var2 + LN_EPS) * g2_ref[...] + be2_ref[...]

    out_ref[0] = out.astype(out_ref.dtype)


# --------------------------------------------------------------------------
# Wrapper
# --------------------------------------------------------------------------
def _vmem_limit_bytes():
    """Generation-aware VMEM request: ~80% of physical (≈100 MiB on v5e/v6e 128 MiB
    parts, ≈51 MiB on v7x 64 MiB parts), capped at 100 MiB."""
    default_cap = 128 * 1024 * 1024
    try:
        cap = getattr(pltpu.get_tpu_info(), "vmem_capacity_bytes", default_cap) or default_cap
    except Exception:
        cap = default_cap
    return min(int(cap * 0.8), 100 * 1024 * 1024)


def transformer_encoder_layer(x, mask, params, *, n_heads, q_tile=None):
    """x: (B, T, D) float32, mask: (B, T) {0,1}. Returns (out, mask)."""
    B, T, D = x.shape
    dk = D // n_heads
    F = params["w1"].shape[1]
    if q_tile is None:
        q_tile = min(T, 256)
    assert T % q_tile == 0, "T must be a multiple of the query tile"
    nQ = T // q_tile
    scale = 1.0 / math.sqrt(dk)

    bf16 = jnp.bfloat16
    f32 = jnp.float32
    x = x.astype(f32)
    mask3 = mask.astype(f32).reshape(B, 1, T)

    # bf16 copies of matmul weights (MXU-native); biases / LN params stay f32.
    # 1/sqrt(dk) folded into Wq / bq once here (zero kernel cost).
    wq = (params["wq"] * scale).astype(bf16)
    bq = (params["bq"] * scale).astype(f32)
    wk = params["wk"].astype(bf16)
    wv = params["wv"].astype(bf16)
    wo = params["wo"].astype(bf16)
    w1 = params["w1"].astype(bf16)
    w2 = params["w2"].astype(bf16)
    bk, bv = params["bk"].astype(f32), params["bv"].astype(f32)
    bo, b1, b2 = (params[k].astype(f32) for k in ("bo", "b1", "b2"))
    g1, be1, g2, be2 = (params[k].astype(f32) for k in ("g1", "be1", "g2", "be2"))

    vmem_limit = _vmem_limit_bytes()
    cparams_a = pltpu.CompilerParams(
        dimension_semantics=("parallel",), vmem_limit_bytes=vmem_limit)
    cparams_b = pltpu.CompilerParams(
        dimension_semantics=("parallel", "parallel"), vmem_limit_bytes=vmem_limit)

    # ---- Kernel A: project K (pre-transposed) / V into head-major bf16 ----
    kv_kernel = functools.partial(_kv_proj_kernel, n_heads=n_heads)
    kt_shape = jax.ShapeDtypeStruct((B, n_heads, dk, T), bf16)
    v_shape = jax.ShapeDtypeStruct((B, n_heads, T, dk), bf16)
    k_hm, v_hm = pl.pallas_call(
        kv_kernel,
        out_shape=(kt_shape, v_shape),
        grid_spec=pltpu.PrefetchScalarGridSpec(
            num_scalar_prefetch=0,
            grid=(B,),
            in_specs=[
                pl.BlockSpec((1, T, D), lambda b: (b, 0, 0)),   # x (full T per batch)
                pl.BlockSpec((D, D), lambda b: (0, 0)),         # wk
                pl.BlockSpec((1, D), lambda b: (0, 0)),         # bk
                pl.BlockSpec((D, D), lambda b: (0, 0)),         # wv
                pl.BlockSpec((1, D), lambda b: (0, 0)),         # bv
            ],
            out_specs=(
                pl.BlockSpec((1, n_heads, dk, T), lambda b: (b, 0, 0, 0)),
                pl.BlockSpec((1, n_heads, T, dk), lambda b: (b, 0, 0, 0)),
            ),
        ),
        compiler_params=cparams_a,
    )(x, wk, bk, wv, bv)

    # ---- Kernel B: Q proj + attention + output proj + LN1 + FFN + LN2 ----
    # TODO(synk): pipeline_mode=pl.Buffered(1) on the constant-index_map weight
    # specs below would halve their VMEM footprint on v7x; omitted to keep
    # compatibility with Pallas versions that don't honor pipeline_mode.
    attn_kernel = functools.partial(_attn_ffn_kernel, n_heads=n_heads)
    out = pl.pallas_call(
        attn_kernel,
        out_shape=jax.ShapeDtypeStruct((B, T, D), f32),
        grid_spec=pltpu.PrefetchScalarGridSpec(
            num_scalar_prefetch=0,
            grid=(B, nQ),
            in_specs=[
                pl.BlockSpec((1, q_tile, D), lambda b, q: (b, q, 0)),              # x tile
                pl.BlockSpec((1, 1, T), lambda b, q: (b, 0, 0)),                   # mask
                pl.BlockSpec((1, n_heads, dk, T), lambda b, q: (b, 0, 0, 0)),      # K^T full
                pl.BlockSpec((1, n_heads, T, dk), lambda b, q: (b, 0, 0, 0)),      # V full
                pl.BlockSpec((D, D), lambda b, q: (0, 0)),                         # wq (scaled)
                pl.BlockSpec((1, D), lambda b, q: (0, 0)),                         # bq (scaled)
                pl.BlockSpec((D, D), lambda b, q: (0, 0)),                         # wo
                pl.BlockSpec((1, D), lambda b, q: (0, 0)),                         # bo
                pl.BlockSpec((D, F), lambda b, q: (0, 0)),                         # w1
                pl.BlockSpec((1, F), lambda b, q: (0, 0)),                         # b1
                pl.BlockSpec((F, D), lambda b, q: (0, 0)),                         # w2
                pl.BlockSpec((1, D), lambda b, q: (0, 0)),                         # b2
                pl.BlockSpec((1, D), lambda b, q: (0, 0)),                         # g1
                pl.BlockSpec((1, D), lambda b, q: (0, 0)),                         # be1
                pl.BlockSpec((1, D), lambda b, q: (0, 0)),                         # g2
                pl.BlockSpec((1, D), lambda b, q: (0, 0)),                         # be2
            ],
            out_specs=pl.BlockSpec((1, q_tile, D), lambda b, q: (b, q, 0)),
        ),
        compiler_params=cparams_b,
    )(x, mask3, k_hm, v_hm, wq, bq, wo, bo, w1, b1, w2, b2, g1, be1, g2, be2)
    return out, mask


# ---------------- pure-JAX reference (mirrors the kernel's bf16 MXU numerics) ----------------
def reference(x, mask, p, n_heads):
    bf = jnp.bfloat16
    f32 = jnp.float32
    B, T, D = x.shape
    dk = D // n_heads
    scale = 1.0 / math.sqrt(dk)
    xb = x.astype(bf)

    def mm(a, w):
        return jnp.dot(a, w.astype(bf), preferred_element_type=f32)

    q = (mm(xb, p["wq"] * scale) + p["bq"] * scale).astype(bf)
    k = (mm(xb, p["wk"]) + p["bk"]).astype(bf)
    v = (mm(xb, p["wv"]) + p["bv"]).astype(bf)

    def split(t):
        return t.reshape(B, T, n_heads, dk).transpose(0, 2, 1, 3)

    qh, kh, vh = split(q), split(k), split(v)
    bias = jnp.where(mask > 0.0, 0.0, NEG_INF)[:, None, None, :]
    scores = jnp.einsum("bhqd,bhkd->bhqk", qh, kh,
                        preferred_element_type=f32) + bias
    attn = jax.nn.softmax(scores, axis=-1)
    attn = jnp.where(mask[:, None, None, :] > 0.0, attn, 0.0)
    ctx = jnp.einsum("bhqk,bhkd->bhqd", attn.astype(bf), vh,
                     preferred_element_type=f32)
    ctx = ctx.transpose(0, 2, 1, 3).reshape(B, T, D)
    attn_out = mm(ctx.astype(bf), p["wo"]) + p["bo"]

    def ln(t, g, b):
        mu = t.mean(-1, keepdims=True)
        var = ((t - mu) ** 2).mean(-1, keepdims=True)
        return (t - mu) * jax.lax.rsqrt(var + LN_EPS) * g + b

    x1 = ln(x + attn_out, p["g1"], p["be1"])
    h1 = jnp.maximum(mm(x1.astype(bf), p["w1"]) + p["b1"], 0.0)
    ff = mm(h1.astype(bf), p["w2"]) + p["b2"]
    return ln(x1 + ff, p["g2"], p["be2"])


if __name__ == "__main__":
    # small shapes: batch=2, seq=32, d_model=64, heads=4 (dk=16), linear_units=128
    B, T, D, H, F = 2, 32, 64, 4, 128
    Q_TILE = 16   # 2 query tiles per batch element -> exercises the (B, nQ) grid

    key = jax.random.PRNGKey(0)
    ks = jax.random.split(key, 16)

    def w(k, shape, scale=0.1):
        return scale * jax.random.normal(k, shape, dtype=jnp.float32)

    # Linear weights stored as (in, out): y = x @ W + b (== PyTorch x @ W.T)
    params = {
        "wq": w(ks[0], (D, D)), "bq": w(ks[1], (1, D)),
        "wk": w(ks[2], (D, D)), "bk": w(ks[3], (1, D)),
        "wv": w(ks[4], (D, D)), "bv": w(ks[5], (1, D)),
        "wo": w(ks[6], (D, D)), "bo": w(ks[7], (1, D)),
        "w1": w(ks[8], (D, F)), "b1": w(ks[9], (1, F)),
        "w2": w(ks[10], (F, D)), "b2": w(ks[11], (1, D)),
        "g1": jnp.ones((1, D), jnp.float32), "be1": jnp.zeros((1, D), jnp.float32),
        "g2": jnp.ones((1, D), jnp.float32), "be2": jnp.zeros((1, D), jnp.float32),
    }

    x = jax.random.normal(ks[12], (B, T, D), dtype=jnp.float32)
    lengths = jnp.array([T, 21])
    mask = (jnp.arange(T)[None, :] < lengths[:, None]).astype(jnp.float32)  # (B, T)

    # TODO(synk): normalize_before=True / concat_after=True branches not wired
    # (module defaults are False/False, which is what this kernel implements).
    out, out_mask = transformer_encoder_layer(x, mask, params, n_heads=H, q_tile=Q_TILE)
    out = jax.block_until_ready(out)

    ref = reference(x, mask, params, H)
    err = float(jnp.max(jnp.abs(out - ref)))
    assert jnp.allclose(out, ref, atol=1e-2, rtol=1e-2), f"max abs err {err}"
    print("KERNEL_OK")
</pallas_src>

<mosaic_0001>
module attributes {stable_mosaic.version = 11 : i64} {
  func.func @_kv_proj_kernel(%arg0: i32, %arg1: memref<1x32x64xf32, #tpu.memory_space<vmem>>, %arg2: memref<64x64xbf16, #tpu.memory_space<vmem>>, %arg3: memref<1x64xf32, #tpu.memory_space<vmem>>, %arg4: memref<64x64xbf16, #tpu.memory_space<vmem>>, %arg5: memref<1x64xf32, #tpu.memory_space<vmem>>, %arg6: memref<1x4x16x32xbf16, #tpu.memory_space<vmem>>, %arg7: memref<1x4x32x16xbf16, #tpu.memory_space<vmem>>) attributes {dimension_semantics = [#tpu.dimension_semantics<parallel>], iteration_bounds = array<i64: 2>, scalar_prefetch = 0 : i64, scratch_operands = 0 : i64, tpu.core_type = #tpu.core_type<tc>, window_params = [{transform_indices = @transform_0, window_bounds = array<i64: 1, 32, 64>}, {pipeline_mode = #tpu.pipeline_mode<synchronous>, transform_indices = @transform_1, window_bounds = array<i64: 64, 64>}, {pipeline_mode = #tpu.pipeline_mode<synchronous>, transform_indices = @transform_2, window_bounds = array<i64: 1, 64>}, {pipeline_mode = #tpu.pipeline_mode<synchronous>, transform_indices = @transform_3, window_bounds = array<i64: 64, 64>}, {pipeline_mode = #tpu.pipeline_mode<synchronous>, transform_indices = @transform_4, window_bounds = array<i64: 1, 64>}, {transform_indices = @transform_5, window_bounds = array<i64: 1, 4, 16, 32>}, {transform_indices = @transform_6, window_bounds = array<i64: 1, 4, 32, 16>}]} {
    %c0 = arith.constant 0 : index
    %c0_0 = arith.constant 0 : index
    %c0_1 = arith.constant 0 : index
    %0 = vector.load %arg1[%c0, %c0_0, %c0_1] : memref<1x32x64xf32, #tpu.memory_space<vmem>>, vector<1x32x64xf32>
    %1 = vector.shape_cast %0 : vector<1x32x64xf32> to vector<32x64xf32>
    %2 = arith.truncf %1 : vector<32x64xf32> to vector<32x64xbf16>
    %c0_2 = arith.constant 0 : index
    %c0_3 = arith.constant 0 : index
    %3 = vector.load %arg2[%c0_2, %c0_3] : memref<64x64xbf16, #tpu.memory_space<vmem>>, vector<64x64xbf16>
    %cst = arith.constant dense<0.000000e+00> : vector<32x64xf32>
    %4 = tpu.matmul %2, %3, %cst {dimension_numbers = #tpu.dot_dimension_numbers<[1], [0], [0], [1], [0, 0, 1, 1], [], []>} : vector<32x64xbf16>, vector<64x64xbf16>, vector<32x64xf32> -> vector<32x64xf32>
    %c0_4 = arith.constant 0 : index
    %c0_5 = arith.constant 0 : index
    %5 = vector.load %arg3[%c0_4, %c0_5] : memref<1x64xf32, #tpu.memory_space<vmem>>, vector<1x64xf32>
    %6 = vector.broadcast %5 : vector<1x64xf32> to vector<32x64xf32>
    %7 = arith.addf %4, %6 : vector<32x64xf32>
    %c0_6 = arith.constant 0 : index
    %c0_7 = arith.constant 0 : index
    %8 = vector.load %arg4[%c0_6, %c0_7] : memref<64x64xbf16, #tpu.memory_space<vmem>>, vector<64x64xbf16>
    %cst_8 = arith.constant dense<0.000000e+00> : vector<32x64xf32>
    %9 = tpu.matmul %2, %8, %cst_8 {dimension_numbers = #tpu.dot_dimension_numbers<[1], [0], [0], [1], [0, 0, 1, 1], [], []>} : vector<32x64xbf16>, vector<64x64xbf16>, vector<32x64xf32> -> vector<32x64xf32>
    %c0_9 = arith.constant 0 : index
    %c0_10 = arith.constant 0 : index
    %10 = vector.load %arg5[%c0_9, %c0_10] : memref<1x64xf32, #tpu.memory_space<vmem>>, vector<1x64xf32>
    %11 = vector.broadcast %10 : vector<1x64xf32> to vector<32x64xf32>
    %12 = arith.addf %9, %11 : vector<32x64xf32>
    %13 = tpu.transpose %7, [1, 0] : vector<32x64xf32> -> vector<64x32xf32>
    %14 = arith.truncf %12 : vector<32x64xf32> to vector<32x64xbf16>
    %15 = vector.extract_strided_slice %13 {offsets = [0, 0], sizes = [16, 32], strides = [1, 1]} : vector<64x32xf32> to vector<16x32xf32>
    %16 = arith.truncf %15 : vector<16x32xf32> to vector<16x32xbf16>
    %c0_11 = arith.constant 0 : index
    %c0_12 = arith.constant 0 : index
    %c0_13 = arith.constant 0 : index
    %c0_14 = arith.constant 0 : index
    %17 = vector.load %arg6[%c0_11, %c0_12, %c0_13, %c0_14] : memref<1x4x16x32xbf16, #tpu.memory_space<vmem>>, vector<1x1x16x32xbf16>
    %18 = vector.shape_cast %17 : vector<1x1x16x32xbf16> to vector<16x32xbf16>
    %19 = vector.shape_cast %16 : vector<16x32xbf16> to vector<1x1x16x32xbf16>
    tpu.vector_store %arg6[%c0_11, %c0_12, %c0_13, %c0_14], %19 {strides = array<i32>} : memref<1x4x16x32xbf16, #tpu.memory_space<vmem>>, vector<1x1x16x32xbf16>,
    %20 = vector.extract_strided_slice %14 {offsets = [0, 0], sizes = [32, 16], strides = [1, 1]} : vector<32x64xbf16> to vector<32x16xbf16>
    %c0_15 = arith.constant 0 : index
    %c0_16 = arith.constant 0 : index
    %c0_17 = arith.constant 0 : index
    %c0_18 = arith.constant 0 : index
    %21 = vector.load %arg7[%c0_15, %c0_16, %c0_17, %c0_18] : memref<1x4x32x16xbf16, #tpu.memory_space<vmem>>, vector<1x1x32x16xbf16>
    %22 = vector.shape_cast %21 : vector<1x1x32x16xbf16> to vector<32x16xbf16>
    %23 = vector.shape_cast %20 : vector<32x16xbf16> to vector<1x1x32x16xbf16>
    tpu.vector_store %arg7[%c0_15, %c0_16, %c0_17, %c0_18], %23 {strides = array<i32>} : memref<1x4x32x16xbf16, #tpu.memory_space<vmem>>, vector<1x1x32x16xbf16>,
    %24 = vector.extract_strided_slice %13 {offsets = [16, 0], sizes = [16, 32], strides = [1, 1]} : vector<64x32xf32> to vector<16x32xf32>
    %25 = arith.truncf %24 : vector<16x32xf32> to vector<16x32xbf16>
    %c0_19 = arith.constant 0 : index
    %c1 = arith.constant 1 : index
    %c0_20 = arith.constant 0 : index
    %c0_21 = arith.constant 0 : index
    %26 = vector.load %arg6[%c0_19, %c1, %c0_20, %c0_21] : memref<1x4x16x32xbf16, #tpu.memory_space<vmem>>, vector<1x1x16x32xbf16>
    %27 = vector.shape_cast %26 : vector<1x1x16x32xbf16> to vector<16x32xbf16>
    %28 = vector.shape_cast %25 : vector<16x32xbf16> to vector<1x1x16x32xbf16>
    tpu.vector_store %arg6[%c0_19, %c1, %c0_20, %c0_21], %28 {strides = array<i32>} : memref<1x4x16x32xbf16, #tpu.memory_space<vmem>>, vector<1x1x16x32xbf16>,
    %29 = vector.extract_strided_slice %14 {offsets = [0, 16], sizes = [32, 16], strides = [1, 1]} : vector<32x64xbf16> to vector<32x16xbf16>
    %c0_22 = arith.constant 0 : index
    %c1_23 = arith.constant 1 : index
    %c0_24 = arith.constant 0 : index
    %c0_25 = arith.constant 0 : index
    %30 = vector.load %arg7[%c0_22, %c1_23, %c0_24, %c0_25] : memref<1x4x32x16xbf16, #tpu.memory_space<vmem>>, vector<1x1x32x16xbf16>
    %31 = vector.shape_cast %30 : vector<1x1x32x16xbf16> to vector<32x16xbf16>
    %32 = vector.shape_cast %29 : vector<32x16xbf16> to vector<1x1x32x16xbf16>
    tpu.vector_store %arg7[%c0_22, %c1_23, %c0_24, %c0_25], %32 {strides = array<i32>} : memref<1x4x32x16xbf16, #tpu.memory_space<vmem>>, vector<1x1x32x16xbf16>,
    %33 = vector.extract_strided_slice %13 {offsets = [32, 0], sizes = [16, 32], strides = [1, 1]} : vector<64x32xf32> to vector<16x32xf32>
    %34 = arith.truncf %33 : vector<16x32xf32> to vector<16x32xbf16>
    %c0_26 = arith.constant 0 : index
    %c2 = arith.constant 2 : index
    %c0_27 = arith.constant 0 : index
    %c0_28 = arith.constant 0 : index
    %35 = vector.load %arg6[%c0_26, %c2, %c0_27, %c0_28] : memref<1x4x16x32xbf16, #tpu.memory_space<vmem>>, vector<1x1x16x32xbf16>
    %36 = vector.shape_cast %35 : vector<1x1x16x32xbf16> to vector<16x32xbf16>
    %37 = vector.shape_cast %34 : vector<16x32xbf16> to vector<1x1x16x32xbf16>
    tpu.vector_store %arg6[%c0_26, %c2, %c0_27, %c0_28], %37 {strides = array<i32>} : memref<1x4x16x32xbf16, #tpu.memory_space<vmem>>, vector<1x1x16x32xbf16>,
    %38 = vector.extract_strided_slice %14 {offsets = [0, 32], sizes = [32, 16], strides = [1, 1]} : vector<32x64xbf16> to vector<32x16xbf16>
    %c0_29 = arith.constant 0 : index
    %c2_30 = arith.constant 2 : index
    %c0_31 = arith.constant 0 : index
    %c0_32 = arith.constant 0 : index
    %39 = vector.load %arg7[%c0_29, %c2_30, %c0_31, %c0_32] : memref<1x4x32x16xbf16, #tpu.memory_space<vmem>>, vector<1x1x32x16xbf16>
    %40 = vector.shape_cast %39 : vector<1x1x32x16xbf16> to vector<32x16xbf16>
    %41 = vector.shape_cast %38 : vector<32x16xbf16> to vector<1x1x32x16xbf16>
    tpu.vector_store %arg7[%c0_29, %c2_30, %c0_31, %c0_32], %41 {strides = array<i32>} : memref<1x4x32x16xbf16, #tpu.memory_space<vmem>>, vector<1x1x32x16xbf16>,
    %42 = vector.extract_strided_slice %13 {offsets = [48, 0], sizes = [16, 32], strides = [1, 1]} : vector<64x32xf32> to vector<16x32xf32>
    %43 = arith.truncf %42 : vector<16x32xf32> to vector<16x32xbf16>
    %c0_33 = arith.constant 0 : index
    %c3 = arith.constant 3 : index
    %c0_34 = arith.constant 0 : index
    %c0_35 = arith.constant 0 : index
    %44 = vector.load %arg6[%c0_33, %c3, %c0_34, %c0_35] : memref<1x4x16x32xbf16, #tpu.memory_space<vmem>>, vector<1x1x16x32xbf16>
    %45 = vector.shape_cast %44 : vector<1x1x16x32xbf16> to vector<16x32xbf16>
    %46 = vector.shape_cast %43 : vector<16x32xbf16> to vector<1x1x16x32xbf16>
    tpu.vector_store %arg6[%c0_33, %c3, %c0_34, %c0_35], %46 {strides = array<i32>} : memref<1x4x16x32xbf16, #tpu.memory_space<vmem>>, vector<1x1x16x32xbf16>,
    %47 = vector.extract_strided_slice %14 {offsets = [0, 48], sizes = [32, 16], strides = [1, 1]} : vector<32x64xbf16> to vector<32x16xbf16>
    %c0_36 = arith.constant 0 : index
    %c3_37 = arith.constant 3 : index
    %c0_38 = arith.constant 0 : index
    %c0_39 = arith.constant 0 : index
    %48 = vector.load %arg7[%c0_36, %c3_37, %c0_38, %c0_39] : memref<1x4x32x16xbf16, #tpu.memory_space<vmem>>, vector<1x1x32x16xbf16>
    %49 = vector.shape_cast %48 : vector<1x1x32x16xbf16> to vector<32x16xbf16>
    %50 = vector.shape_cast %47 : vector<32x16xbf16> to vector<1x1x32x16xbf16>
    tpu.vector_store %arg7[%c0_36, %c3_37, %c0_38, %c0_39], %50 {strides = array<i32>} : memref<1x4x32x16xbf16, #tpu.memory_space<vmem>>, vector<1x1x32x16xbf16>,
    return
  }
  func.func @transform_0(%arg0: i32) -> (i32, i32, i32) {
    %c0_i32 = arith.constant 0 : i32
    %c0_i32_0 = arith.constant 0 : i32
    %c0_i32_1 = arith.constant 0 : i32
    return %arg0, %c0_i32, %c0_i32_0 : i32, i32, i32
  }
  func.func @transform_1(%arg0: i32) -> (i32, i32) {
    %c0_i32 = arith.constant 0 : i32
    %c0_i32_0 = arith.constant 0 : i32
    %c0_i32_1 = arith.constant 0 : i32
    return %c0_i32, %c0_i32_0 : i32, i32
  }
  func.func @transform_2(%arg0: i32) -> (i32, i32) {
    %c0_i32 = arith.constant 0 : i32
    %c0_i32_0 = arith.constant 0 : i32
    %c0_i32_1 = arith.constant 0 : i32
    return %c0_i32, %c0_i32_0 : i32, i32
  }
  func.func @transform_3(%arg0: i32) -> (i32, i32) {
    %c0_i32 = arith.constant 0 : i32
    %c0_i32_0 = arith.constant 0 : i32
    %c0_i32_1 = arith.constant 0 : i32
    return %c0_i32, %c0_i32_0 : i32, i32
  }
  func.func @transform_4(%arg0: i32) -> (i32, i32) {
    %c0_i32 = arith.constant 0 : i32
    %c0_i32_0 = arith.constant 0 : i32
    %c0_i32_1 = arith.constant 0 : i32
    return %c0_i32, %c0_i32_0 : i32, i32
  }
  func.func @transform_5(%arg0: i32) -> (i32, i32, i32, i32) {
    %c0_i32 = arith.constant 0 : i32
    %c0_i32_0 = arith.constant 0 : i32
    %c0_i32_1 = arith.constant 0 : i32
    %c0_i32_2 = arith.constant 0 : i32
    return %arg0, %c0_i32, %c0_i32_0, %c0_i32_1 : i32, i32, i32, i32
  }
  func.func @transform_6(%arg0: i32) -> (i32, i32, i32, i32) {
    %c0_i32 = arith.constant 0 : i32
    %c0_i32_0 = arith.constant 0 : i32
    %c0_i32_1 = arith.constant 0 : i32
    %c0_i32_2 = arith.constant 0 : i32
    return %arg0, %c0_i32, %c0_i32_0, %c0_i32_1 : i32, i32, i32, i32
  }
}

</mosaic_0001>

<bundles_post_ra>
// kernel: tpu_custom_call.1
= control target key start
LH: loop header
LB: loop body
LE: loop exit
PB: predicated region body
PF: predicated region fallthrough
CT: control target
= control target key end

     0   :  { %12 = vsyncpa [#allocation3], 0  ;;  %s1288_s0 = inlined_call_operand.hbm [shape: f32[2,32,64], index: 0, kind: input, shape index: {}]   ;;  %s1289_s1 = inlined_call_operand.hbm [shape: bf16[64,64], index: 1, kind: input, shape index: {}]   ;;  %s1290_s2 = inlined_call_operand.vmem [shape: f32[1,64], index: 2, kind: input, shape index: {}]   ;;  %s1291_s3 = inlined_call_operand.hbm [shape: bf16[64,64], index: 3, kind: input, shape index: {}]   ;;  %s1292_s4 = inlined_call_operand.vmem [shape: f32[1,64], index: 4, kind: input, shape index: {}]   ;;  %s1293_s5 = inlined_call_operand.hbm [shape: bf16[2,4,16,32], index: 5, kind: output, shape index: {0}]   ;;  %s1294_s6 = inlined_call_operand.vmem [shape: bf16[2,4,32,16], index: 6, kind: output, shape index: {1}]  }
   0x1   :  { %14 = vsyncpa [#allocation3 + $0x1], 0 }
   0x2   :  { %15 = vsyncpa [#allocation6], 0 }
   0x3   :  { %16 = vsyncpa [#allocation4], 0 }
   0x4   :  { %18 = vsyncpa [#allocation4 + $0x1], 0  ;;  %s1079_s21 = smov 0   ;;  %s1081_s22 = smov 0  }
   0x5   :  { %s1083_s23 = smov 0   ;;  %s1085_s24 = smov 0  }
   0x6 LB: > { %s1100_s25 = sadd.s32 4294967295, %s1031_s24   ;;  %s699_s26 = sadd.s32 4294967294, %s1031_s24   ;;  %s1031_s24 = sphi %s1085_s24, %s1304_s24   ;;  %s1027_s23 = sphi %s1083_s23, %s1303_s23   ;;  %s1023_s22 = sphi %s1081_s22, %s1302_s22   ;;  %s1019_s21 = sphi %s1079_s21, %s1301_s21  }
   0x7   : > { %p44_p0 = scmp.ne.s32.totalorder %s1023_s22, %s1019_s21  ;;  %p45_p1 = scmp.eq.s32.totalorder %s1100_s25, 0 }
   0x8   : > { %p152_p2 = scmp.eq.s32.totalorder %s1100_s25, 1  ;;  %p158_p3 = scmp.eq.s32.totalorder %s699_s26, 1 }
   0x9   : > { %p1109_p4 = por %p45_p1, %p44_p0  ;;  %p700_p5 = scmp.ge.s32.totalorder %s1031_s24, 1 }
   0xa   : > { %p1114_p6 = por %p158_p3, %p44_p0  ;;  %p191_p7 = scmp.lt.s32.totalorder %s1031_s24, 3 }
   0xb   : > { %s202_s7 = sshll.u32 %s1289_s1, 4  ;;  %s1033_s9 = smov [#allocation5]   ;;  %s203_s7 = int_to_ptr.hbm [resolvable:$true] %s202_s7 }
   0xc   : > { %p1122_p8 = pnand %p700_p5, %p191_p7  ;;  %s204_s10 = sshll.u32 %s1033_s9, 4  ;;  %s205_s10 = int_to_ptr.vmem [resolvable:$true] %s204_s10 }
   0xd   : > { %s219_s13 = sshll.u32 %s1291_s3, 4  ;;  %s1034_s14 = smov 64   ;;  %s220_s13 = int_to_ptr.hbm [resolvable:$true] %s219_s13 }
   0xe   : > { %p804_p9 = pneg %p1122_p8  ;;  %s1035_s15 = smov 4  }
   0xf   : > { %s1036_s16 = smov [#allocation7]   ;;  %s1135_s18 = sadd.s32 1, %s1031_s24  }
  0x10   : > { %p805_p10 = pnand %p804_p9, %p45_p1  ;;  %s221_s17 = sshll.u32 %s1036_s16, 4  ;;  %s222_s17 = int_to_ptr.vmem [resolvable:$true] %s221_s17 }
  0x11   : > { %s31_s19 = sadd.s32 1, %s1027_s23  ;;  %s28_s20 = ssub.s32 %s1031_s24, %s1135_s18 }
  0x12   : > { %807 = dma.hbm_to_vmem [thread:$0]  (!%p805_p10), %s203_s7, 512, %s205_s10, [#allocation6], %s1034_s14, %s1034_s14, %s1035_s15  }
  0x13   : > { %810 = dma.hbm_to_vmem [thread:$0]  (!%p805_p10), %s220_s13, 512, %s222_s17, [#allocation6], %s1034_s14, %s1034_s14, %s1035_s15  }
  0x14   : > { %p38_p12 = scmp.ne.s32.totalorder %s1027_s23, %s1023_s22  ;;  %p29_p13 = scmp.eq.s32.totalorder %s28_s20, 0 }
  0x15   : > { %p39_p0 = scmp.eq.s32.totalorder %s1031_s24, 0  ;;  %p821_p5 = scmp.lt.s32.totalorder %s1031_s24, 2 }
  0x16   : > { %p1145_p3 = por %p152_p2, %p38_p12  ;;  %s238_s30 = sand.u32 1, %s1027_s23  }
  0x17   : > { %s1151_s29 = scalar_select %p29_p13, %s1027_s23, %s31_s19  }
  0x18   : > { %p40_p7 = por %p39_p0, %p38_p12  ;;  %s704_s7 = sshll.u32 %s238_s30, 5 }
  0x19   : > { %s773_s9 = sshll.u32 %s1031_s24, 5  ;;  %s242_s13 = scalar_lea.vmem [#allocation2], %s704_s7 }
  0x1a   : > { %s247_s12 = scalar_lea.hbm %s1288_s0, %s773_s9  ;;  %s250_s14 = sshll.u32 %s242_s13, 4  ;;  %s251_s14 = int_to_ptr.vmem [resolvable:$true] %s250_s14 }
  0x1b   : > { %s248_s15 = sshll.u32 %s247_s12, 4  ;;  %p1158_p2 = pnand %p821_p5, %p40_p7  ;;  %s249_s15 = int_to_ptr.hbm [resolvable:$true] %s248_s15 }
  0x1c   : > { %s239_s17 = scalar_lea.sflag [#allocation3], %s238_s30  ;;  %s931_s19 = sshra.s32 %s249_s15, 4  ;;  %s932_s19 = int_to_ptr.hbm [resolvable:$true] %s931_s19 }
  0x1d   : > { %s933_s20 = scalar_lea.hbm %s932_s19, 32  ;;  %p935_p10 = pneg %p1158_p2 }
  0x1e   : > { %p934_p9 = scmp.ne.s32.totalorder %s932_s19, %s933_s20  ;;  %s938_s10 = scalar_lea.hbm %s1288_s0, 64 }
  0x1f   : > { %p939_p0 = scmp.lt.s32.totalorder %s932_s19, %s1288_s0  ;;  %p940_p5 = scmp.lt.s32.totalorder %s938_s10, %s933_s20 }
  0x20   : > { %p936_p12 = pnand %p935_p10, %p934_p9 }
  0x21   : > { %p941_p7 = por %p940_p5, %p939_p0 }
  0x22   : > { %p937_p13 = pneg %p936_p12 }
  0x24   : > { %p942_p11 = pnand %p941_p7, %p937_p13 }
  0x26   : > { %945 = shalt.err (!%p942_p11)
}
  0x27   : > { %s1037_s30 = smov 128   ;;  %s1038_s13 = smov 8  }
  0x28   : > { %814 = dma.hbm_to_vmem [thread:$0]  (!%p1158_p2), %s249_s15, 512, %s251_s14, %s239_s17, %s1037_s30, %s1037_s30, %s1038_s13  }
  0x29   : > { %262 = sbr.rel (%p1122_p8) target bundleno = 475 (0x1db), region = 40  ;;  %s1175_s9 = sand.u32 (!%p1122_p8), 1, %s1023_s22  }
  0x2a   : > { %s708_s19 = sshll.u32 (!%p1122_p8), %s1175_s9, 5  ;;  %s265_s20 = scalar_lea.sflag (!%p1122_p8), [#allocation3], %s1175_s9 }
  0x2b   : > { %s268_s7 = scalar_lea.vmem (!%p1122_p8), [#allocation2], %s708_s19 }
  0x2e   : > { %1006 = dma.done.wait (%p1109_p4), %s265_s20, 512  }
  0x2f   : > { %1008 = vsyncadd (%p1109_p4), %s265_s20, 4294966784 }
  0x30   : > { %1010 = dma.done.wait (%p45_p1), [#allocation6], 1024  }
  0x31   : > { %1012 = vsyncadd (%p45_p1), [#allocation6], 4294966272  ;;  %v778_v0 = vld [vmem:[#allocation5 + $0x18] sm:$0xff]  ;;  %v777_v1 = vld [vmem:[#allocation5 + $0x10] sm:$0xff]  ;;  %vm361_vm0 = vcmask 523264   ;;  %p313_p1 = scmp.lt.s32.totalorder %s1100_s25, 1 }
  0x32   : > { %372 = vmatpush.bf16.msra.mxu0 %v778_v0  ;;  %784 = vmatpush.bf16.msra.mxu2 %v778_v0  ;;  %v782_v2 = vld [vmem:[#allocation7 + $0x18] sm:$0xff]  ;;  %v781_v3 = vld [vmem:[#allocation7 + $0x10] sm:$0xff]  ;;  %v776_v4 = vld [vmem:[#allocation5 + $0x8] sm:$0xff]  ;;  %vm483_vm1 = vcmask 125952   ;;  %s1039_s30 = smov 112   ;;  %s1040_s13 = smov 96  }
  0x33   : > { %427 = vmatpush.bf16.msra.mxu1 %v782_v2  ;;  %788 = vmatpush.bf16.msra.mxu3 %v782_v2  ;;  %v780_v5 = vld [vmem:[#allocation7 + $0x8] sm:$0xff]  ;;  %v775_v6 = vld [vmem:[#allocation5] sm:$0xff]  ;;  %v321_v9 = vld [vmem:[%s268_s7 + $0x10] sm:$0xff]  ;;  %s314_s14 = scalar_select %p313_p1, %s1100_s25, 1  ;;  %vm480_vm2 = vcmask 257024  }
  0x34   : > { %v319_v7 = vld [vmem:[%s268_s7] sm:$0xff]  ;;  %v320_v8 = vld [vmem:[%s268_s7 + $0x8] sm:$0xff]  ;;  %v322_v10 = vld [vmem:[%s268_s7 + $0x18] sm:$0xff]  ;;  %s1041_s20 = smov 80   ;;  %s1228_s7 = scalar_lea.vmem [#allocation8], %s708_s19 }
  0x35   : > { %v779_v11 = vld [vmem:[#allocation7] sm:$0xff]  ;;  %v323_v12 = vpack.c.bf16 %v320_v8, %v319_v7  ;;  %v324_v13 = vpack.c.bf16 %v322_v10, %v321_v9  ;;  %s774_s17 = sshll.u32 %s314_s14, 6  ;;  %s783_s19 = sshll.u32 %s1100_s25, 5 }
  0x36   : > { %373 = vmatpush.bf16.msra.mxu0 %v777_v1  ;;  %785 = vmatpush.bf16.msra.mxu2 %v777_v1  ;;  %v869_v14 = vld [vmem:[%s1290_s2] ss:$0 sm:$0xff]  ;;  %s1200_s12 = scalar_lea.vmem %s1294_s6, %s774_s17  ;;  %s575_s14 = scalar_lea.hbm %s1293_s5, %s783_s19 }
  0x37   : > { %428 = vmatpush.bf16.msra.mxu1 %v781_v3  ;;  %789 = vmatpush.bf16.msra.mxu3 %v781_v3  ;;  %v870_v15 = vld [vmem:[%s1292_s4] ss:$0 sm:$0xff]  ;;  %s576_s15 = sshll.u32 %s1228_s7, 4  ;;  %s578_s16 = sshll.u32 %s575_s14, 4  ;;  %s577_s15 = int_to_ptr.vmem [resolvable:$true] %s576_s15  ;;  %s579_s16 = int_to_ptr.hbm [resolvable:$true] %s578_s16 }
  0x38   : > { %s559_s17 = scalar_lea.sflag [#allocation4], %s1175_s9  ;;  %s975_s10 = sshra.s32 %s579_s16, 4  ;;  %s976_s10 = int_to_ptr.hbm [resolvable:$true] %s975_s10 }
  0x39   : > { %s977_s25 = scalar_lea.hbm %s976_s10, 32  ;;  %p982_p2 = scmp.lt.s32.totalorder %s976_s10, %s1293_s5 }
  0x3a   : > { %374 = vmatpush.bf16.msra.mxu0 %v776_v4  ;;  %786 = vmatpush.bf16.msra.mxu2 %v776_v4  ;;  %p978_p4 = scmp.ne.s32.totalorder %s976_s10, %s977_s25 }
  0x3b   : > { %429 = vmatpush.bf16.msra.mxu1 %v780_v5  ;;  %790 = vmatpush.bf16.msra.mxu3 %v780_v5 }
  0x3c   : > { %p979_p8 = pnand %p978_p4, %p1145_p3 }
  0x3e   : > { %375 = vmatpush.bf16.msra.mxu0 %v775_v6  ;;  %787 = vmatpush.bf16.msra.mxu2 %v775_v6  ;;  %p980_p11 = pneg %p979_p8 }
  0x3f   : > { %430 = vmatpush.bf16.msra.mxu1 %v779_v11  ;;  %791 = vmatpush.bf16.msra.mxu3 %v779_v11 }
  0x41   : > { %730 = vmatmul.msk.bf16.vlgmr.msra.gmra.mxu0 %vm361_vm0, %v323_v12  ;;  %731 = vmatmul.msk.bf16.vlgmr.msra.gmra.mxu2 %vm361_vm0, %v324_v13 }
  0x42   : > { %748 = vmatmul.msk.bf16.vlgmr.msra.gmra.mxu1 %vm361_vm0, %v323_v12  ;;  %749 = vmatmul.msk.bf16.vlgmr.msra.gmra.mxu3 %vm361_vm0, %v324_v13 }
  0xbe   : > { %v377_v16 = vpop.f32.mrf.mxu0 }
  0xbf   : > { %v378_v17 = vadd.f32 %v869_v14, %v377_v16  ;;  %v432_v18 = vpop.f32.mrf.mxu1 }
  0xc0   : > { %v433_v19 = vadd.f32 %v870_v15, %v432_v18 }
  0xc1   : > { %442 = vxpose.xlu0.b32.start [1/4] (short) (narrow) %v378_v17, 64 }
  0xc2   : > { %v474_v20 = vpack.c.bf16 %v433_v19, %v433_v19 }
  0xc4   : > { %484 = vst.msk [vmem:[%s1200_s12] sm:$0xf] %vm483_vm1, %v474_v20  ;;  %497 = vrot.lane.b32.xlu1 %v474_v20, %s1039_s30  ;;  %v382_v28 = vpop.f32.mrf.mxu2 }
  0xc5   : > { %v437_v22 = vpop.f32.mrf.mxu3  ;;  %v383_v30 = vadd.f32 %v869_v14, %v382_v28 }
  0xc6   : > { %v379_v21 = vpop.f32.mrf.mxu0  ;;  %v438_v24 = vadd.f32 %v870_v15, %v437_v22 }
  0xc7   : > { %v380_v23 = vadd.f32 %v869_v14, %v379_v21  ;;  %v434_v25 = vpop.f32.mrf.mxu1 }
  0xc8   : > { %v476_v26 = vpack.c.bf16 %v438_v24, %v438_v24  ;;  %v435_v27 = vadd.f32 %v870_v15, %v434_v25 }
  0xc9   : > { %443 = vxpose.xlu0.b32.cont [2/4] (short) (narrow) %v380_v23, 64 }
  0xca   : > { %486 = vst.msk [vmem:[%s1200_s12 + $0x8] sm:$0xf] %vm483_vm1, %v476_v26  ;;  %501 = vrot.lane.b32.xlu2 %v476_v26, %s1039_s30  ;;  %v475_v29 = vpack.c.bf16 %v435_v27, %v435_v27 }
  0xcc   : > { %519 = vrot.lane.b32.xlu1 %v474_v20, %s1040_s13  ;;  %485 = vst.msk [vmem:[%s1200_s12 + $0x4] sm:$0xf] %vm483_vm1, %v475_v29  ;;  %v384_v34 = vpop.f32.mrf.mxu2 }
  0xcd   : > { %v439_v31 = vpop.f32.mrf.mxu3  ;;  %v385_v35 = vadd.f32 %v869_v14, %v384_v34 }
  0xce   : > { %v440_v32 = vadd.f32 %v870_v15, %v439_v31 }
  0xd0   : > { %v477_v33 = vpack.c.bf16 %v440_v32, %v440_v32 }
  0xd1   : > { %444 = vxpose.xlu0.b32.cont [3/4] (short) (narrow) %v383_v30, 64 }
  0xd2   : > { %521 = vrot.lane.b32.xlu2 %v475_v29, %s1040_s13  ;;  %487 = vst.msk [vmem:[%s1200_s12 + $0xc] sm:$0xf] %vm483_vm1, %v477_v33 }
  0xd4   : > { %523 = vrot.lane.b32.xlu1 %v476_v26, %s1040_s13 }
  0xd9   : > { %445 = vxpose.xlu0.b32.end [4/4] (short) (narrow) %v385_v35, 64 }
  0xda   : > { %503 = vrot.lane.b32.xlu2 %v477_v33, %s1039_s30 }
  0xdc   : > { %499 = vrot.lane.b32.xlu1 %v475_v29, %s1039_s30 }
  0xe2   : > { %525 = vrot.lane.b32.xlu2 %v477_v33, %s1040_s13  ;;  %s981_s13 = scalar_lea.hbm %s1293_s5, 64 }
  0xe3   : > { %p983_p9 = scmp.lt.s32.totalorder %s981_s13, %s977_s25 }
  0xe4   : > { %543 = vrot.lane.b32.xlu1 %v475_v29, %s1041_s20 }
  0xe5   : > { %p984_p10 = por %p983_p9, %p982_p2 }
  0xe7   : > { %p985_p12 = pnand %p984_p10, %p980_p11 }
  0xea   : > { %545 = vrot.lane.b32.xlu2 %v476_v26, %s1041_s20 }
  0xec   : > { %547 = vrot.lane.b32.xlu1 %v477_v33, %s1041_s20 }
 0x124   : > { %v502_v36 = vpop.permute.xlu2 %501 }
 0x125   : > { %754 = vst.msk [vmem:[%s1200_s12 + $0x18] sm:$0xf] %vm483_vm1, %v502_v36 }
 0x12c   : > { %v522_v38 = vpop.permute.xlu2 %521 }
 0x12d   : > { %759 = vst.msk [vmem:[%s1200_s12 + $0x24] sm:$0xf] %vm483_vm1, %v522_v38 }
 0x134   : > { %v504_v40 = vpop.permute.xlu2 %503 }
 0x135   : > { %755 = vst.msk [vmem:[%s1200_s12 + $0x1c] sm:$0xf] %vm483_vm1, %v504_v40 }
 0x136   : > { %v498_v37 = vpop.permute.xlu1 %497 }
 0x137   : > { %752 = vst.msk [vmem:[%s1200_s12 + $0x10] sm:$0xf] %vm483_vm1, %v498_v37 }
 0x13c   : > { %v526_v42 = vpop.permute.xlu2 %525 }
 0x13d   : > { %761 = vst.msk [vmem:[%s1200_s12 + $0x2c] sm:$0xf] %vm483_vm1, %v526_v42 }
 0x13e   : > { %v520_v39 = vpop.permute.xlu1 %519 }
 0x13f   : > { %758 = vst.msk [vmem:[%s1200_s12 + $0x20] sm:$0xf] %vm483_vm1, %v520_v39 }
 0x144   : > { %v546_v46 = vpop.permute.xlu2 %545 }
 0x145   : > { %766 = vst.msk [vmem:[%s1200_s12 + $0x38] sm:$0xf] %vm483_vm1, %v546_v46 }
 0x146   : > { %v524_v41 = vpop.permute.xlu1 %523 }
 0x147   : > { %760 = vst.msk [vmem:[%s1200_s12 + $0x28] sm:$0xf] %vm483_vm1, %v524_v41 }
 0x14e   : > { %v500_v43 = vpop.permute.xlu1 %499 }
 0x14f   : > { %753 = vst.msk [vmem:[%s1200_s12 + $0x14] sm:$0xf] %vm483_vm1, %v500_v43 }
 0x156   : > { %v544_v47 = vpop.permute.xlu1 %543 }
 0x157   : > { %765 = vst.msk [vmem:[%s1200_s12 + $0x34] sm:$0xf] %vm483_vm1, %v544_v47 }
 0x15e   : > { %v548_v50 = vpop.permute.xlu1 %547 }
 0x15f   : > { %767 = vst.msk [vmem:[%s1200_s12 + $0x3c] sm:$0xf] %vm483_vm1, %v548_v50 }
 0x165   : > { %v458_v44 = vpop.trf.xlu0 }
 0x166   : > { %v478_v45 = vpack.c.bf16 %v458_v44, %v458_v44 }
 0x167   : > { %541 = vrot.lane.b32.xlu0 %v474_v20, %s1041_s20 }
 0x168   : > { %481 = vst.msk [vmem:[%s1228_s7] sm:$0xf] %vm480_vm2, %v478_v45 }
 0x16d   : > { %v459_v48 = vpop.trf.xlu0 }
 0x16e   : > { %v479_v49 = vpack.c.bf16 %v459_v48, %v459_v48 }
 0x170   : > { %482 = vst.msk [vmem:[%s1228_s7 + $0x4] sm:$0xf] %vm480_vm2, %v479_v49 }
 0x175   : > { %v460_v51 = vpop.trf.xlu0 }
 0x176   : > { %v488_v52 = vpack.c.bf16 %v460_v51, %v460_v51 }
 0x178   : > { %750 = vst.msk [vmem:[%s1228_s7 + $0x8] sm:$0xf] %vm480_vm2, %v488_v52 }
 0x17d   : > { %v461_v53 = vpop.trf.xlu0 }
 0x17e   : > { %v489_v54 = vpack.c.bf16 %v461_v53, %v461_v53 }
 0x180   : > { %751 = vst.msk [vmem:[%s1228_s7 + $0xc] sm:$0xf] %vm480_vm2, %v489_v54 }
 0x185   : > { %v462_v55 = vpop.trf.xlu0 }
 0x186   : > { %v514_v56 = vpack.c.bf16 %v462_v55, %v462_v55 }
 0x188   : > { %756 = vst.msk [vmem:[%s1228_s7 + $0x10] sm:$0xf] %vm480_vm2, %v514_v56 }
 0x18d   : > { %v463_v57 = vpop.trf.xlu0 }
 0x18e   : > { %v515_v58 = vpack.c.bf16 %v463_v57, %v463_v57 }
 0x190   : > { %757 = vst.msk [vmem:[%s1228_s7 + $0x14] sm:$0xf] %vm480_vm2, %v515_v58 }
 0x195   : > { %v464_v59 = vpop.trf.xlu0 }
 0x196   : > { %v536_v60 = vpack.c.bf16 %v464_v59, %v464_v59 }
 0x198   : > { %762 = vst.msk [vmem:[%s1228_s7 + $0x18] sm:$0xf] %vm480_vm2, %v536_v60 }
 0x19d   : > { %v465_v61 = vpop.trf.xlu0 }
 0x19e   : > { %v537_v62 = vpack.c.bf16 %v465_v61, %v465_v61 }
 0x1a0   : > { %763 = vst.msk [vmem:[%s1228_s7 + $0x1c] sm:$0xf] %vm480_vm2, %v537_v62 }
 0x1a1   : > { %988 = shalt.err (!%p985_p12)
}
 0x1a2   : > { %s1042_s9 = smov 64   ;;  %s1043_s7 = smov 4  }
 0x1a3   : > { %802 = dma.vmem_to_hbm [thread:$0]  (%p1145_p3), %s577_s15, 512, %s579_s16, %s559_s17, %s1042_s9, %s1042_s9, %s1043_s7  }
 0x1d9   : > { %v542_v63 = vpop.permute.xlu0 %541 }
 0x1da   : > { %764 = vst.msk [vmem:[%s1200_s12 + $0x30] sm:$0xf] %vm483_vm1, %v542_v63 }
 0x1db PF: > { %s596_s27 = sand.u32 1, %s1019_s21   ;;  %p1300_p13 = scmp.ge.s32.totalorder %s1031_s24, 2 }
 0x1dc   : > { %s597_s8 = scalar_lea.sflag [#allocation4], %s596_s27 }
 0x1dd   : > { %p816_p0 = pnand %p1300_p13, %p1114_p6 }
 0x1df   : > { %p817_p5 = pneg %p816_p0 }
 0x1e1   : > { %1014 = dma.done.wait (%p817_p5), %s597_s8, 512  }
 0x1e2   : > { %1016 = vsyncadd (%p817_p5), %s597_s8, 4294966784  ;;  %p21_p3 = scmp.ge.s32.totalorder %s1135_s18, 4   ;;  %s1301_s21 = smov %s1023_s22 }
 0x1e3   : > { %s1302_s22 = smov %s1027_s23  ;;  %s1303_s23 = smov %s1151_s29 }
 0x1e4   : > { %s1304_s24 = smov %s1135_s18  ;;  %23 = sbr.rel (!%p21_p3) target bundleno = 6 (0x6), region = 111 }
 0x1e9   :  { %611 = vsyncpa [#allocation3], 1 }
 0x1ea   :  { %613 = vsyncpa [#allocation3 + $0x1], 1 }
 0x1eb   :  { %614 = vsyncpa [#allocation6], 1 }
 0x1ec   :  { %615 = vsyncpa [#allocation4], 1 }
 0x1ed   :  { %617 = vsyncpa [#allocation4 + $0x1], 1 }

</bundles_post_ra>
